<compile_context>
chip_gen: v7x
topology: tpu7x:2x2x1
jax: 0.10.0
libtpu: 0.0.40
codegen_flags: <defaults>
</compile_context>

<pallas_src>
import jax
import jax.numpy as jnp
import numpy as np
from jax.experimental import pallas as pl
from jax.experimental.pallas import tpu as pltpu

FAC_FWD = 0.25


def make_haar_weights(level: int) -> np.ndarray:
    """Deterministic, non-trainable parameter init, mirroring HaarConv.__init__."""
    in_channels = 4 ** level
    w = np.ones((4, 1, 2, 2), dtype=np.float32)
    w[1, 0, 0, 1] = -1
    w[1, 0, 1, 1] = -1
    w[2, 0, 1, 0] = -1
    w[2, 0, 1, 1] = -1
    w[3, 0, 1, 0] = -1
    w[3, 0, 0, 1] = -1
    return np.concatenate([w] * in_channels, axis=0)  # (4*C, 1, 2, 2)


def _haar_q_matrix(w: int) -> np.ndarray:
    """Fused constant Q (2W, 4*Wo): stride-2 column deinterleave + horizontal Haar
    (+/-0.25 folded in) for the even-row half, and the same with the vertical Haar
    signs folded in for the odd-row half.  Result columns [k*Wo:(k+1)*Wo] are the
    four conv filters k=0..3 of the original module."""
    wo = w // 2
    ps = np.zeros((w, wo), np.float32)   # 0.25*(left+right)
    pd = np.zeros((w, wo), np.float32)   # 0.25*(left-right)
    cols = np.arange(wo)
    ps[2 * cols, cols] = FAC_FWD
    ps[2 * cols + 1, cols] = FAC_FWD
    pd[2 * cols, cols] = FAC_FWD
    pd[2 * cols + 1, cols] = -FAC_FWD
    top = np.concatenate([ps, pd, ps, pd], axis=1)       # even input rows
    bot = np.concatenate([ps, pd, -ps, -pd], axis=1)     # odd input rows
    return np.concatenate([top, bot], axis=0)            # (2W, 4*Wo)


def _haar_kernel(q_ref, x_ref, o_ref):
    # x_ref: (Cb, THo, 2W) -- row ho of channel c holds [x[2*ho,:], x[2*ho+1,:]] contiguously.
    # q_ref: (2W, 4*Wo) fused +/-0.25 constant.
    # o_ref: (Cb, 4, THo, Wo)
    cb, tho, w2 = x_ref.shape
    wo = o_ref.shape[-1]
    # Free leading-dim collapse (THo is a sublane multiple whenever Cb > 1).
    lhs = x_ref[...].reshape(cb * tho, w2)
    # Single MXU matmul: column deinterleave + horizontal + vertical Haar, scale folded in.
    r = jnp.dot(
        lhs,
        q_ref[...],
        preferred_element_type=jnp.float32,
        precision=jax.lax.Precision.HIGHEST,   # keep the +/-0.25 shuffle-matmul exact
    )                                           # (Cb*THo, 4*Wo)
    # Four lane-slice stores per step (independent of the channel fold Cb).
    for k in range(4):
        o_ref[:, k, :, :] = (
            r[:, k * wo:(k + 1) * wo].reshape(cb, tho, wo).astype(o_ref.dtype)
        )


def _vmem_limit_bytes() -> int:
    """Generation-aware scoped-VMEM limit: ~3/4 of per-core VMEM, capped at 96 MiB.
    Fallback assumes v7x's 64 MiB per-core VMEM (safe on every generation)."""
    cap = 64 * 1024 * 1024
    try:
        cap = int(pltpu.get_tpu_info().vmem_capacity_bytes)
    except Exception:
        pass
    return min(cap * 3 // 4, 96 * 1024 * 1024)


def _pick_tiles(nc: int, ho: int, w: int, wo: int, itemsize: int, budget: int):
    """Pick (channel_fold Cb, row_tile THo): largest blocks whose lane/sublane-padded,
    double-buffered VMEM footprint fits `budget` (mem-bound kernel -> big DMAs)."""
    def rup(v, m):
        return -(-v // m) * m

    q_bytes = rup(2 * w, 8) * rup(4 * wo, 128) * 4          # constant Q (f32)

    def in_bytes(cb, tho):
        return cb * rup(tho, 8) * rup(2 * w, 128) * itemsize

    def out_bytes(cb, tho):
        return cb * 4 * rup(tho, 8) * rup(wo, 128) * itemsize

    tho_cands = sorted({d for d in range(8, ho + 1, 8) if ho % d == 0} | {ho})
    cb_cands = [d for d in range(1, nc + 1) if nc % d == 0]
    target = max(budget // 3, 1)    # leave ~1/3 headroom after double buffering

    best_key, best = None, None
    for tho in tho_cands:
        # Channel folding relies on a free (Cb,THo,2W)->(Cb*THo,2W) collapse: needs THo % 8 == 0.
        for cb in (cb_cands if tho % 8 == 0 else [1]):
            blk = in_bytes(cb, tho) + out_bytes(cb, tho)
            if 2 * blk + 2 * q_bytes > budget:               # in/out and Q double-buffered
                continue
            under = blk <= target
            key = (under, blk if under else -blk, tho, cb)
            if best_key is None or key > best_key:
                best_key, best = key, (cb, tho)
    if best is None:
        # TODO(synk): W-chunked grid axis for huge W where the Q constant alone blows the budget.
        return 1, tho_cands[0]
    return best


def haar_conv(x: jax.Array) -> jax.Array:
    """Pallas implementation of HaarConv.forward. x: (N, C, H, W)."""
    N, C, H, W = x.shape
    if H % 2 or W % 2:
        raise ValueError("HaarConv requires even H and W")
    Ho, Wo = H // 2, W // 2
    NC = N * C

    # Free contiguous reshape: last dim packs the input row pair (2*ho, 2*ho+1).
    xr = x.reshape(NC, Ho, 2 * W)
    q = jnp.asarray(_haar_q_matrix(W))

    vmem_limit = _vmem_limit_bytes()
    cb, t_ho = _pick_tiles(NC, Ho, W, Wo, x.dtype.itemsize, int(vmem_limit * 0.8))
    grid = (NC // cb, Ho // t_ho)

    cost = pl.CostEstimate(
        flops=8 * NC * Ho * W * W,
        transcendentals=0,
        bytes_accessed=2 * x.size * x.dtype.itemsize + int(q.size) * 4,
    )

    out = pl.pallas_call(
        _haar_kernel,
        out_shape=jax.ShapeDtypeStruct((NC, 4, Ho, Wo), x.dtype),
        grid=grid,
        in_specs=[
            pl.BlockSpec((2 * W, 4 * Wo), lambda b, j: (0, 0)),        # fused constant Q
            pl.BlockSpec((cb, t_ho, 2 * W), lambda b, j: (b, j, 0)),   # row-pair-packed input
        ],
        out_specs=pl.BlockSpec((cb, 4, t_ho, Wo), lambda b, j: (b, 0, j, 0)),
        compiler_params=pltpu.CompilerParams(
            dimension_semantics=("parallel", "parallel"),
            vmem_limit_bytes=vmem_limit,
        ),
        cost_estimate=cost,
    )(q, xr)

    # (N*C, 4, Ho, Wo) -> (N, 4*C, Ho, Wo); channel 4*c+k matches the grouped-conv order.
    return out.reshape(N, 4 * C, Ho, Wo)


def haar_conv_ref(x: jax.Array) -> jax.Array:
    """Pure-JAX reference of the grouped stride-2 Haar conv."""
    N, C, H, W = x.shape
    a = x[:, :, 0::2, 0::2]
    b = x[:, :, 0::2, 1::2]
    c = x[:, :, 1::2, 0::2]
    d = x[:, :, 1::2, 1::2]
    out = jnp.stack(
        [a + b + c + d, a - b + c - d, a + b - c - d, a - b - c + d], axis=2
    ) * FAC_FWD
    return out.reshape(N, C * 4, H // 2, W // 2)


if __name__ == "__main__":
    level = 1                      # in_channels = 4**level = 4
    N, C, H, W = 2, 4 ** level, 16, 16

    key = jax.random.PRNGKey(0)
    x = jax.random.normal(key, (N, C, H, W), dtype=jnp.float32)

    _ = make_haar_weights(level)   # fixed, non-trainable params of the original module

    y = jax.block_until_ready(haar_conv(x))
    y_ref = jax.block_until_ready(haar_conv_ref(x))

    assert y.shape == (N, 4 * C, H // 2, W // 2), y.shape
    np.testing.assert_allclose(np.asarray(y), np.asarray(y_ref), rtol=1e-6, atol=1e-6)

    print("KERNEL_OK")
</pallas_src>

<mosaic_0001>
module attributes {stable_mosaic.version = 11 : i64} {
  func.func @_haar_kernel(%arg0: i32, %arg1: i32, %arg2: memref<32x32xf32, #tpu.memory_space<vmem>>, %arg3: memref<8x8x32xf32, #tpu.memory_space<vmem>>, %arg4: memref<8x4x8x8xf32, #tpu.memory_space<vmem>>) attributes {dimension_semantics = [#tpu.dimension_semantics<parallel>, #tpu.dimension_semantics<parallel>], iteration_bounds = array<i64: 1, 1>, scalar_prefetch = 0 : i64, scratch_operands = 0 : i64, tpu.core_type = #tpu.core_type<tc>, window_params = [{pipeline_mode = #tpu.pipeline_mode<synchronous>, transform_indices = @transform_0, window_bounds = array<i64: 32, 32>}, {transform_indices = @transform_1, window_bounds = array<i64: 8, 8, 32>}, {transform_indices = @transform_2, window_bounds = array<i64: 8, 4, 8, 8>}]} {
    %c0 = arith.constant 0 : index
    %c0_0 = arith.constant 0 : index
    %c0_1 = arith.constant 0 : index
    %0 = vector.load %arg3[%c0, %c0_0, %c0_1] : memref<8x8x32xf32, #tpu.memory_space<vmem>>, vector<8x8x32xf32>
    %1 = vector.shape_cast %0 : vector<8x8x32xf32> to vector<64x32xf32>
    %c0_2 = arith.constant 0 : index
    %c0_3 = arith.constant 0 : index
    %2 = vector.load %arg2[%c0_2, %c0_3] : memref<32x32xf32, #tpu.memory_space<vmem>>, vector<32x32xf32>
    %cst = arith.constant dense<0.000000e+00> : vector<64x32xf32>
    %3 = tpu.matmul %1, %2, %cst {dimension_numbers = #tpu.dot_dimension_numbers<[1], [0], [0], [1], [0, 0, 1, 1], [], []>, precision = #tpu.contract_precision<fp32>} : vector<64x32xf32>, vector<32x32xf32>, vector<64x32xf32> -> vector<64x32xf32>
    %4 = vector.extract_strided_slice %3 {offsets = [0, 0], sizes = [64, 8], strides = [1, 1]} : vector<64x32xf32> to vector<64x8xf32>
    %5 = vector.shape_cast %4 : vector<64x8xf32> to vector<8x8x8xf32>
    %c0_4 = arith.constant 0 : index
    %c0_5 = arith.constant 0 : index
    %c0_6 = arith.constant 0 : index
    %c0_7 = arith.constant 0 : index
    %6 = vector.load %arg4[%c0_4, %c0_5, %c0_6, %c0_7] : memref<8x4x8x8xf32, #tpu.memory_space<vmem>>, vector<8x1x8x8xf32>
    %7 = vector.shape_cast %6 : vector<8x1x8x8xf32> to vector<8x8x8xf32>
    %8 = vector.shape_cast %5 : vector<8x8x8xf32> to vector<8x1x8x8xf32>
    tpu.vector_store %arg4[%c0_4, %c0_5, %c0_6, %c0_7], %8 {strides = array<i32>} : memref<8x4x8x8xf32, #tpu.memory_space<vmem>>, vector<8x1x8x8xf32>,
    %9 = vector.extract_strided_slice %3 {offsets = [0, 8], sizes = [64, 8], strides = [1, 1]} : vector<64x32xf32> to vector<64x8xf32>
    %10 = vector.shape_cast %9 : vector<64x8xf32> to vector<8x8x8xf32>
    %c0_8 = arith.constant 0 : index
    %c1 = arith.constant 1 : index
    %c0_9 = arith.constant 0 : index
    %c0_10 = arith.constant 0 : index
    %11 = vector.load %arg4[%c0_8, %c1, %c0_9, %c0_10] : memref<8x4x8x8xf32, #tpu.memory_space<vmem>>, vector<8x1x8x8xf32>
    %12 = vector.shape_cast %11 : vector<8x1x8x8xf32> to vector<8x8x8xf32>
    %13 = vector.shape_cast %10 : vector<8x8x8xf32> to vector<8x1x8x8xf32>
    tpu.vector_store %arg4[%c0_8, %c1, %c0_9, %c0_10], %13 {strides = array<i32>} : memref<8x4x8x8xf32, #tpu.memory_space<vmem>>, vector<8x1x8x8xf32>,
    %14 = vector.extract_strided_slice %3 {offsets = [0, 16], sizes = [64, 8], strides = [1, 1]} : vector<64x32xf32> to vector<64x8xf32>
    %15 = vector.shape_cast %14 : vector<64x8xf32> to vector<8x8x8xf32>
    %c0_11 = arith.constant 0 : index
    %c2 = arith.constant 2 : index
    %c0_12 = arith.constant 0 : index
    %c0_13 = arith.constant 0 : index
    %16 = vector.load %arg4[%c0_11, %c2, %c0_12, %c0_13] : memref<8x4x8x8xf32, #tpu.memory_space<vmem>>, vector<8x1x8x8xf32>
    %17 = vector.shape_cast %16 : vector<8x1x8x8xf32> to vector<8x8x8xf32>
    %18 = vector.shape_cast %15 : vector<8x8x8xf32> to vector<8x1x8x8xf32>
    tpu.vector_store %arg4[%c0_11, %c2, %c0_12, %c0_13], %18 {strides = array<i32>} : memref<8x4x8x8xf32, #tpu.memory_space<vmem>>, vector<8x1x8x8xf32>,
    %19 = vector.extract_strided_slice %3 {offsets = [0, 24], sizes = [64, 8], strides = [1, 1]} : vector<64x32xf32> to vector<64x8xf32>
    %20 = vector.shape_cast %19 : vector<64x8xf32> to vector<8x8x8xf32>
    %c0_14 = arith.constant 0 : index
    %c3 = arith.constant 3 : index
    %c0_15 = arith.constant 0 : index
    %c0_16 = arith.constant 0 : index
    %21 = vector.load %arg4[%c0_14, %c3, %c0_15, %c0_16] : memref<8x4x8x8xf32, #tpu.memory_space<vmem>>, vector<8x1x8x8xf32>
    %22 = vector.shape_cast %21 : vector<8x1x8x8xf32> to vector<8x8x8xf32>
    %23 = vector.shape_cast %20 : vector<8x8x8xf32> to vector<8x1x8x8xf32>
    tpu.vector_store %arg4[%c0_14, %c3, %c0_15, %c0_16], %23 {strides = array<i32>} : memref<8x4x8x8xf32, #tpu.memory_space<vmem>>, vector<8x1x8x8xf32>,
    return
  }
  func.func @transform_0(%arg0: i32, %arg1: i32) -> (i32, i32) {
    %c0_i32 = arith.constant 0 : i32
    %c0_i32_0 = arith.constant 0 : i32
    %c0_i32_1 = arith.constant 0 : i32
    return %c0_i32, %c0_i32_0 : i32, i32
  }
  func.func @transform_1(%arg0: i32, %arg1: i32) -> (i32, i32, i32) {
    %c0_i32 = arith.constant 0 : i32
    %c0_i32_0 = arith.constant 0 : i32
    return %arg0, %arg1, %c0_i32 : i32, i32, i32
  }
  func.func @transform_2(%arg0: i32, %arg1: i32) -> (i32, i32, i32, i32) {
    %c0_i32 = arith.constant 0 : i32
    %c0_i32_0 = arith.constant 0 : i32
    %c0_i32_1 = arith.constant 0 : i32
    return %arg0, %c0_i32, %arg1, %c0_i32_0 : i32, i32, i32, i32
  }
}

</mosaic_0001>

<bundles_post_ra>
// kernel: tpu_custom_call.1
= control target key start
LH: loop header
LB: loop body
LE: loop exit
PB: predicated region body
PF: predicated region fallthrough
CT: control target
= control target key end

     0   :  { %7 = vsyncpa [#allocation3], 0  ;;  %s1606_s0 = inlined_call_operand.hbm [shape: f32[32,32], index: 0, kind: input, shape index: {}]   ;;  %s1607_s1 = inlined_call_operand.hbm [shape: f32[8,8,32], index: 1, kind: input, shape index: {}]   ;;  %s1608_s2 = inlined_call_operand.hbm [shape: f32[8,4,8,8], index: 2, kind: output, shape index: {}]  }
   0x1   :  { %8 = vsyncpa [#allocation6], 0 }
   0x2   :  { %9 = vsyncpa [#allocation4], 0  ;;  %s1357_s9 = smov [#allocation2]   ;;  %s1285_s13 = scalar_lea.hbm %s1606_s0, 512 }
   0x3   :  { %s15_s10 = sshll.u32 %s1357_s9, 4  ;;  %p1286_p0 = scmp.ne.s32.totalorder %s1606_s0, %s1285_s13  ;;  %s16_s10 = int_to_ptr.vmem [resolvable:$true] %s15_s10 }
   0x4   :  { %p1289_p1 = scmp.lt.u32.totalorder %s1285_s13, %s1606_s0 }
   0x6   :  { %p1291_p2 = pnand %p1289_p1, %p1286_p0 }
   0x8   :  { %1294 = shalt.err (!%p1291_p2)
}
   0x9   :  { %s1295_s18 = scalar_lea.vmem %s16_s10, 512  ;;  %p1300_p4 = scmp.lt.s32.totalorder %s16_s10, %s16_s10 }
   0xa   :  { %p1296_p3 = scmp.ne.s32.totalorder %s16_s10, %s1295_s18  ;;  %p1301_p5 = scmp.lt.s32.totalorder %s1295_s18, %s1295_s18 }
   0xc   :  { %p1302_p6 = por %p1301_p5, %p1300_p4 }
   0xe   :  { %p1303_p7 = pnand %p1302_p6, %p1296_p3 }
  0x10   :  { %1306 = shalt.err (!%p1303_p7)
}
  0x11   :  { %s1358_s19 = smov 128   ;;  %s1359_s20 = smov 8  }
  0x12   :  { %21 = dma.hbm_to_vmem [thread:$0]  %s1606_s0, 512, %s16_s10, [#allocation3], %s1358_s19, %s1358_s19, %s1359_s20  }
  0x13   :  { %s1360_s23 = smov [#allocation5]   ;;  %s1307_s27 = scalar_lea.hbm %s1607_s1, 1024 }
  0x14   :  { %s27_s24 = sshll.u32 %s1360_s23, 4  ;;  %p1308_p8 = scmp.ne.s32.totalorder %s1607_s1, %s1307_s27  ;;  %s28_s24 = int_to_ptr.vmem [resolvable:$true] %s27_s24 }
  0x15   :  { %p1311_p9 = scmp.lt.u32.totalorder %s1307_s27, %s1607_s1 }
  0x17   :  { %p1313_p10 = pnand %p1311_p9, %p1308_p8 }
  0x19   :  { %1316 = shalt.err (!%p1313_p10)
}
  0x1a   :  { %s1317_s4 = scalar_lea.vmem %s28_s24, 1024  ;;  %p1322_p12 = scmp.lt.s32.totalorder %s28_s24, %s28_s24 }
  0x1b   :  { %p1318_p11 = scmp.ne.s32.totalorder %s28_s24, %s1317_s4  ;;  %p1323_p13 = scmp.lt.s32.totalorder %s1317_s4, %s1317_s4 }
  0x1d   :  { %p1324_p0 = por %p1323_p13, %p1322_p12 }
  0x1f   :  { %p1325_p1 = pnand %p1324_p0, %p1318_p11 }
  0x21   :  { %1328 = shalt.err (!%p1325_p1)
}
  0x22   :  { %33 = dma.hbm_to_vmem [thread:$0]  %s1607_s1, 1024, %s28_s24, [#allocation6], %s1358_s19, %s1358_s19, %s1359_s20  }
  0x23   :  { %1351 = dma.done.wait [#allocation3], 512  }
  0x24   :  { %1352 = vsyncadd [#allocation3], 4294966784 }
  0x25   :  { %1353 = dma.done.wait [#allocation6], 1024  }
  0x26   :  { %1354 = vsyncadd [#allocation6], 4294966272  ;;  %vm52_vm0 = vcmask 261120   ;;  %v48_v0 = vld [vmem:[#allocation2] sm:$0xff]  ;;  %v49_v1 = vld [vmem:[#allocation2 + $0x8] sm:$0xff]  ;;  %vm863_vm1 = vcmask 64512  }
  0x27   :  { %v50_v2 = vld [vmem:[#allocation2 + $0x10] sm:$0xff]  ;;  %v78_v3 = vand.u32 4294901760, %v48_v0  ;;  %v81_v4 = vand.u32 4294901760, %v49_v1  ;;  %v1410_v5 = vld [vmem:[#allocation2 + $0x18] sm:$0xff]  ;;  %v40_v7 = vld [vmem:[#allocation5] sm:$0xff]  ;;  %s1361_s1 = smov 112  }
  0x28   :  { %v84_v6 = vand.u32 4294901760, %v50_v2  ;;  %v41_v8 = vld [vmem:[#allocation5 + $0x8] sm:$0xff]  ;;  %v87_v9 = vand.u32 4294901760, %v1410_v5  ;;  %v54_v10 = vsel %vm52_vm0, %v40_v7, 0  ;;  %v42_v12 = vld [vmem:[#allocation5 + $0x10] sm:$0xff]  ;;  %v43_v13 = vld [vmem:[#allocation5 + $0x18] sm:$0xff] }
  0x29   :  { %v57_v11 = vsel %vm52_vm0, %v41_v8, 0  ;;  %v1415_v14 = vpack.c.bf16 %v81_v4, %v78_v3  ;;  %v1417_v15 = vand.u32 4294901760, %v54_v10  ;;  %v1421_v17 = vsub.f32 %v48_v0, %v78_v3  ;;  %v44_v18 = vld [vmem:[#allocation5 + $0x20] sm:$0xff]  ;;  %v45_v19 = vld [vmem:[#allocation5 + $0x28] sm:$0xff]  ;;  %v46_v48 = vld [vmem:[#allocation5 + $0x30] sm:$0xff]  ;;  %s1362_s6 = smov 120  }
  0x2a   :  { %v1419_v16 = vand.u32 4294901760, %v57_v11  ;;  %v1425_v20 = vpack.c.bf16 %v87_v9, %v84_v6  ;;  %v1427_v21 = vsub.f32 %v49_v1, %v81_v4  ;;  %v60_v22 = vsel %vm52_vm0, %v42_v12, 0  ;;  %v47_v57 = vld [vmem:[#allocation5 + $0x38] sm:$0xff]  ;;  %s1363_s7 = smov 104   ;;  %s1364_s8 = smov [#allocation7]  }
  0x2b   :  { %v63_v23 = vsel %vm52_vm0, %v43_v13, 0  ;;  %1190 = vmatprep.subr.bf16.mxu1 %v1415_v14  ;;  %1214 = vmatprep.subr.bf16.mxu0 %v1415_v14  ;;  %v1434_v24 = vsub.f32 %v54_v10, %v1417_v15  ;;  %v229_v26 = vand.u32 4294901760, %v1421_v17  ;;  %v1440_v27 = vand.u32 4294901760, %v60_v22  ;;  %s984_s9 = sshll.u32 %s1364_s8, 4  ;;  %s985_s9 = int_to_ptr.vmem [resolvable:$true] %s984_s9 }
  0x2c   :  { %v1437_v25 = vsub.f32 %v57_v11, %v1419_v16  ;;  %1192 = vmatpush3.bf16.msra.mxu1 %v1415_v14  ;;  %1216 = vmatpush3.bf16.msra.mxu0 %v1415_v14  ;;  %v236_v28 = vand.u32 4294901760, %v1427_v21  ;;  %v1445_v29 = vand.u32 4294901760, %v63_v23  ;;  %v66_v30 = vsel %vm52_vm0, %v44_v18, 0  ;;  %s1329_s10 = scalar_lea.vmem %s985_s9, 4096  ;;  %p1334_p3 = scmp.lt.s32.totalorder %s985_s9, %s985_s9 }
  0x2d   :  { %v69_v31 = vsel %vm52_vm0, %v45_v19, 0  ;;  %1194 = vmatprep.subr.bf16.mxu1 %v1425_v20  ;;  %1218 = vmatprep.subr.bf16.mxu0 %v1425_v20  ;;  %v148_v32 = vand.u32 4294901760, %v1434_v24  ;;  %v230_v34 = vsub.f32 %v1421_v17, %v229_v26  ;;  %v1455_v35 = vsub.f32 %v60_v22, %v1440_v27  ;;  %p1330_p2 = scmp.ne.s32.totalorder %s985_s9, %s1329_s10  ;;  %p1335_p4 = scmp.lt.s32.totalorder %s1329_s10, %s1329_s10 }
  0x2e   :  { %v158_v33 = vand.u32 4294901760, %v1437_v25  ;;  %v237_v36 = vsub.f32 %v1427_v21, %v236_v28  ;;  %v1221_v37 = vpack.c.bf16 %v236_v28, %v229_v26  ;;  %v1459_v38 = vsub.f32 %v63_v23, %v1445_v29 }
  0x2f   :  { %v1461_v39 = vand.u32 4294901760, %v66_v30  ;;  %v149_v40 = vsub.f32 %v1434_v24, %v148_v32  ;;  %1137 = vmatprep.mubr.f32.mxu0 %v148_v32  ;;  %v231_v42 = vand.u32 4294901760, %v230_v34  ;;  %v168_v43 = vand.u32 4294901760, %v1455_v35  ;;  %p1336_p5 = por %p1335_p4, %p1334_p3 }
  0x30   :  { %v159_v41 = vsub.f32 %v1437_v25, %v158_v33  ;;  %1196 = vmatpush3.bf16.msra.mxu1 %v1425_v20  ;;  %1220 = vmatpush3.bf16.msra.mxu0 %v1425_v20  ;;  %v238_v44 = vand.u32 4294901760, %v237_v36  ;;  %v178_v45 = vand.u32 4294901760, %v1459_v38  ;;  %v1472_v47 = vand.u32 4294901760, %v69_v31 }
  0x31   :  { %v1470_v46 = vsub.f32 %v66_v30, %v1461_v39  ;;  %v150_v49 = vand.u32 4294901760, %v149_v40  ;;  %1222 = vmatprep.subr.bf16.mxu0 %v1221_v37  ;;  %v169_v51 = vsub.f32 %v1455_v35, %v168_v43  ;;  %v242_v52 = vsub.f32 %v50_v2, %v84_v6  ;;  %p1337_p6 = pnand %p1336_p5, %p1330_p2 }
  0x32   :  { %v160_v50 = vand.u32 4294901760, %v159_v41  ;;  %v1197_v53 = vpack.c.bf16 %v238_v44, %v231_v42  ;;  %v179_v54 = vsub.f32 %v1459_v38, %v178_v45  ;;  %v1478_v56 = vsub.f32 %v69_v31, %v1472_v47 }
  0x33   :  { %v188_v55 = vand.u32 4294901760, %v1470_v46  ;;  %1077 = vmatprep.mubr.f32.mxu1 %v150_v49  ;;  %1138 = vmatmul.mubr.f32.vlgmr.msra.gmra.mrb[0].mxu0 %v158_v33  ;;  %v170_v58 = vand.u32 4294901760, %v169_v51  ;;  %v243_v59 = vand.u32 4294901760, %v242_v52  ;;  %v249_v60 = vsub.f32 %v1410_v5, %v87_v9 }
  0x34   :  { %v72_v61 = vsel %vm52_vm0, %v46_v48, 0  ;;  %1078 = vmatmul.mubr.f32.vlgmr.msra.gmra.mrb[0].mxu1 %v160_v50  ;;  %1198 = vmatprep.subr.bf16.mxu1 %v1197_v53  ;;  %v180_v62 = vand.u32 4294901760, %v179_v54  ;;  %v198_v0 = vand.u32 4294901760, %v1478_v56  ;;  %v75_v4 = vsel %vm52_vm0, %v47_v57, 0 }
  0x35   :  { %v189_v63 = vsub.f32 %v1470_v46, %v188_v55  ;;  %v1486_v1 = vand.u32 4294901760, %v72_v61  ;;  %1200 = vmatpush3.bf16.msra.mxu1 %v1197_v53  ;;  %1224 = vmatpush3.bf16.msra.mxu0 %v1221_v37  ;;  %v244_v2 = vsub.f32 %v242_v52, %v243_v59  ;;  %v250_v3 = vand.u32 4294901760, %v249_v60 }
  0x36   :  { %1080 = vmatprep.mubr.f32.mxu1 %v170_v58  ;;  %1140 = vmatprep.mubr.f32.mxu0 %v168_v43  ;;  %v199_v6 = vsub.f32 %v1478_v56, %v198_v0  ;;  %v1493_v8 = vand.u32 4294901760, %v75_v4  ;;  %v1205_v28 = vpack.c.bf16 %v1427_v21, %v1421_v17  ;;  %v1209_v33 = vpack.c.bf16 %v249_v60, %v242_v52 }
  0x37   :  { %v190_v5 = vand.u32 4294901760, %v189_v63  ;;  %v1491_v7 = vsub.f32 %v72_v61, %v1486_v1  ;;  %1141 = vmatmul.mubr.f32.gmra.mrb[2].mxu0 %v178_v45  ;;  %v245_v9 = vand.u32 4294901760, %v244_v2  ;;  %v251_v10 = vsub.f32 %v249_v60, %v250_v3 }
  0x38   :  { %v1225_v11 = vpack.c.bf16 %v250_v3, %v243_v59  ;;  %1081 = vmatmul.mubr.f32.gmra.mrb[2].mxu1 %v180_v62  ;;  %1143 = vmatprep.mubr.f32.mxu0 %v188_v55  ;;  %v200_v12 = vand.u32 4294901760, %v199_v6  ;;  %v217_v18 = vsub.f32 %v75_v4, %v1493_v8 }
  0x39   :  { %v208_v13 = vand.u32 4294901760, %v1491_v7  ;;  %1083 = vmatprep.mubr.f32.mxu1 %v190_v5  ;;  %v252_v19 = vand.u32 4294901760, %v251_v10 }
  0x3a   :  { %1226 = vmatprep.subr.bf16.mxu0 %v1225_v11  ;;  %v218_v23 = vand.u32 4294901760, %v217_v18 }
  0x3b   :  { %1228 = vmatpush3.bf16.msra.mxu0 %v1225_v11  ;;  %v209_v22 = vsub.f32 %v1491_v7, %v208_v13  ;;  %v1201_v26 = vpack.c.bf16 %v252_v19, %v245_v9 }
  0x3c   :  { %1144 = vmatmul.mubr.f32.gmra.mrb[4].mxu0 %v198_v0  ;;  %1230 = vmatprep.subr.bf16.mxu0 %v1415_v14  ;;  %v219_v31 = vsub.f32 %v217_v18, %v218_v23 }
  0x3d   :  { %1084 = vmatmul.mubr.f32.gmra.mrb[4].mxu1 %v200_v12  ;;  %v210_v30 = vand.u32 4294901760, %v209_v22  ;;  %1146 = vmatprep.mubr.f32.mxu0 %v208_v13 }
  0x3e   :  { %1202 = vmatprep.subr.bf16.mxu1 %v1201_v26  ;;  %v220_v32 = vand.u32 4294901760, %v219_v31 }
  0x3f   :  { %1204 = vmatpush3.bf16.msra.mxu1 %v1201_v26  ;;  %1086 = vmatprep.mubr.f32.mxu1 %v210_v30 }
  0x40   :  { %1147 = vmatmul.mubr.f32.gmra.mrb[6].mxu0 %v218_v23  ;;  %1206 = vmatprep.subr.bf16.mxu1 %v1205_v28 }
  0x41   :  { %1087 = vmatmul.mubr.f32.gmra.mrb[6].mxu1 %v220_v32  ;;  %1157 = vmatprep.mubr.f32.mxu0 %v1417_v15 }
  0x42   :  { %1097 = vmatprep.mubr.f32.mxu1 %v1417_v15 }
  0x44   :  { %1158 = vmatmul.mubr.f32.vlgmr.msra.gmra.mrb[0].mxu0 %v1419_v16 }
  0x45   :  { %1098 = vmatmul.mubr.f32.vlgmr.msra.gmra.mrb[0].mxu1 %v1419_v16  ;;  %1232 = vmatpush3.bf16.msra.mxu0 %v1415_v14 }
  0x46   :  { %1208 = vmatpush3.bf16.msra.mxu1 %v1205_v28  ;;  %1100 = vmatprep.mubr.f32.mxu1 %v1440_v27 }
  0x47   :  { %1160 = vmatprep.mubr.f32.mxu0 %v1440_v27  ;;  %1210 = vmatprep.subr.bf16.mxu1 %v1209_v33 }
  0x48   :  { %1161 = vmatmul.mubr.f32.gmra.mrb[2].mxu0 %v1445_v29  ;;  %1234 = vmatprep.subr.bf16.mxu0 %v1425_v20 }
  0x49   :  { %1101 = vmatmul.mubr.f32.gmra.mrb[2].mxu1 %v1445_v29  ;;  %1163 = vmatprep.mubr.f32.mxu0 %v1461_v39 }
  0x4a   :  { %1103 = vmatprep.mubr.f32.mxu1 %v1461_v39  ;;  %1212 = vmatpush3.bf16.msra.mxu1 %v1209_v33 }
  0x4b   :  { %1236 = vmatpush3.bf16.msra.mxu0 %v1425_v20 }
  0x4c   :  { %1164 = vmatmul.mubr.f32.gmra.mrb[4].mxu0 %v1472_v47 }
  0x4d   :  { %1104 = vmatmul.mubr.f32.gmra.mrb[4].mxu1 %v1472_v47  ;;  %1166 = vmatprep.mubr.f32.mxu0 %v1486_v1 }
  0x4e   :  { %1106 = vmatprep.mubr.f32.mxu1 %v1486_v1 }
  0x50   :  { %1167 = vmatmul.mubr.f32.gmra.mrb[6].mxu0 %v1493_v8 }
  0x51   :  { %1107 = vmatmul.mubr.f32.gmra.mrb[6].mxu1 %v1493_v8  ;;  %1177 = vmatprep.mubr.f32.mxu0 %v1417_v15 }
  0x52   :  { %1117 = vmatprep.mubr.f32.mxu1 %v1434_v24 }
  0x54   :  { %1178 = vmatmul.mubr.f32.vlgmr.msra.gmra.mrb[0].mxu0 %v1419_v16 }
  0x55   :  { %1118 = vmatmul.mubr.f32.vlgmr.msra.gmra.mrb[0].mxu1 %v1437_v25  ;;  %1180 = vmatprep.mubr.f32.mxu0 %v1440_v27 }
  0x56   :  { %1120 = vmatprep.mubr.f32.mxu1 %v1455_v35 }
  0x58   :  { %1181 = vmatmul.mubr.f32.gmra.mrb[2].mxu0 %v1445_v29 }
  0x59   :  { %1121 = vmatmul.mubr.f32.gmra.mrb[2].mxu1 %v1459_v38  ;;  %1183 = vmatprep.mubr.f32.mxu0 %v1461_v39 }
  0x5a   :  { %1123 = vmatprep.mubr.f32.mxu1 %v1470_v46 }
  0x5c   :  { %1184 = vmatmul.mubr.f32.gmra.mrb[4].mxu0 %v1472_v47 }
  0x5d   :  { %1124 = vmatmul.mubr.f32.gmra.mrb[4].mxu1 %v1478_v56  ;;  %1186 = vmatprep.mubr.f32.mxu0 %v1486_v1 }
  0x5e   :  { %1126 = vmatprep.mubr.f32.mxu1 %v1491_v7 }
  0x60   :  { %1187 = vmatmul.mubr.f32.gmra.mrb[6].mxu0 %v1493_v8 }
  0x61   :  { %1127 = vmatmul.mubr.f32.gmra.mrb[6].mxu1 %v217_v18 }
 0x127   :  { %v1179_v14 = vpop.f32.mrb[0].mxu0 }
 0x128   :  { %v1119_v15 = vpop.f32.mrb[0].mxu1  ;;  %v817_v16 = vpop.f32.mrb[1].mxu0 }
 0x129   :  { %v1237_v17 = vadd.f32 %v1179_v14, %v1119_v15  ;;  %v435_v20 = vpop.f32.mrb[1].mxu1 }
 0x12a   :  { %v1238_v21 = vadd.f32 %v817_v16, %v435_v20 }
 0x12b   :  { %865 = vst.msk [vmem:[#allocation7 + $0x20] sm:$0xff] %vm863_vm1, %v1237_v17  ;;  %915 = vrot.lane.b32.xlu1 %v1237_v17, %s1361_s1  ;;  %882 = vrot.lane.b32.xlu0 %v1237_v17, %s1362_s6  ;;  %v1182_v24 = vpop.f32.mrb[2].mxu0 }
 0x12c   :  { %864 = vst.msk [vmem:[#allocation7] sm:$0xff] %vm863_vm1, %v1238_v21  ;;  %v1122_v25 = vpop.f32.mrb[2].mxu1  ;;  %v829_v27 = vpop.f32.mrb[3].mxu0 }
 0x12d   :  { %v1239_v29 = vadd.f32 %v1182_v24, %v1122_v25  ;;  %v449_v34 = vpop.f32.mrb[3].mxu1 }
 0x12e   :  { %v1240_v35 = vadd.f32 %v829_v27, %v449_v34 }
 0x12f   :  { %867 = vst.msk [vmem:[#allocation7 + $0x60] sm:$0xff] %vm863_vm1, %v1239_v29  ;;  %948 = vrot.lane.b32.xlu1 %v1237_v17, %s1363_s7  ;;  %880 = vrot.lane.b32.xlu0 %v1238_v21, %s1362_s6  ;;  %v1185_v36 = vpop.f32.mrb[4].mxu0 }
 0x130   :  { %866 = vst.msk [vmem:[#allocation7 + $0x40] sm:$0xff] %vm863_vm1, %v1240_v35  ;;  %v1125_v37 = vpop.f32.mrb[4].mxu1  ;;  %v841_v38 = vpop.f32.mrb[5].mxu0 }
 0x131   :  { %v1241_v39 = vadd.f32 %v1185_v36, %v1125_v37  ;;  %v463_v40 = vpop.f32.mrb[5].mxu1 }
 0x132   :  { %v1242_v41 = vadd.f32 %v841_v38, %v463_v40 }
 0x133   :  { %869 = vst.msk [vmem:[#allocation7 + $0xa0] sm:$0xff] %vm863_vm1, %v1241_v39  ;;  %913 = vrot.lane.b32.xlu0 %v1238_v21, %s1361_s1  ;;  %886 = vrot.lane.b32.xlu1 %v1239_v29, %s1362_s6  ;;  %v1188_v42 = vpop.f32.mrb[6].mxu0 }
 0x134   :  { %868 = vst.msk [vmem:[#allocation7 + $0x80] sm:$0xff] %vm863_vm1, %v1242_v41  ;;  %v1128_v43 = vpop.f32.mrb[6].mxu1  ;;  %v853_v44 = vpop.f32.mrb[7].mxu0 }
 0x135   :  { %v1243_v45 = vadd.f32 %v1188_v42, %v1128_v43  ;;  %v477_v46 = vpop.f32.mrb[7].mxu1 }
 0x136   :  { %v1244_v47 = vadd.f32 %v853_v44, %v477_v46 }
 0x137   :  { %871 = vst.msk [vmem:[#allocation7 + $0xe0] sm:$0xff] %vm863_vm1, %v1243_v45  ;;  %946 = vrot.lane.b32.xlu0 %v1238_v21, %s1363_s7  ;;  %919 = vrot.lane.b32.xlu1 %v1239_v29, %s1361_s1 }
 0x138   :  { %870 = vst.msk [vmem:[#allocation7 + $0xc0] sm:$0xff] %vm863_vm1, %v1244_v47 }
 0x13b   :  { %952 = vrot.lane.b32.xlu1 %v1239_v29, %s1363_s7  ;;  %917 = vrot.lane.b32.xlu0 %v1240_v35, %s1361_s1 }
 0x13f   :  { %950 = vrot.lane.b32.xlu0 %v1240_v35, %s1363_s7  ;;  %884 = vrot.lane.b32.xlu1 %v1240_v35, %s1362_s6 }
 0x143   :  { %890 = vrot.lane.b32.xlu1 %v1241_v39, %s1362_s6  ;;  %888 = vrot.lane.b32.xlu0 %v1242_v41, %s1362_s6 }
 0x147   :  { %923 = vrot.lane.b32.xlu1 %v1241_v39, %s1361_s1  ;;  %921 = vrot.lane.b32.xlu0 %v1242_v41, %s1361_s1 }
 0x14b   :  { %956 = vrot.lane.b32.xlu1 %v1241_v39, %s1363_s7  ;;  %954 = vrot.lane.b32.xlu0 %v1242_v41, %s1363_s7 }
 0x14f   :  { %894 = vrot.lane.b32.xlu1 %v1243_v45, %s1362_s6  ;;  %892 = vrot.lane.b32.xlu0 %v1244_v47, %s1362_s6 }
 0x153   :  { %927 = vrot.lane.b32.xlu1 %v1243_v45, %s1361_s1  ;;  %925 = vrot.lane.b32.xlu0 %v1244_v47, %s1361_s1 }
 0x157   :  { %960 = vrot.lane.b32.xlu1 %v1243_v45, %s1363_s7  ;;  %958 = vrot.lane.b32.xlu0 %v1244_v47, %s1363_s7 }
 0x19d   :  { %v916_v48 = vpop.permute.xlu1 %915  ;;  %v883_v49 = vpop.permute.xlu0 %882 }
 0x19e   :  { %939 = vst.msk [vmem:[#allocation7 + $0x30] sm:$0xff] %vm863_vm1, %v916_v48  ;;  %906 = vst.msk [vmem:[#allocation7 + $0x28] sm:$0xff] %vm863_vm1, %v883_v49 }
 0x1a1   :  { %v949_v50 = vpop.permute.xlu1 %948  ;;  %v881_v51 = vpop.permute.xlu0 %880 }
 0x1a2   :  { %972 = vst.msk [vmem:[#allocation7 + $0x38] sm:$0xff] %vm863_vm1, %v949_v50  ;;  %905 = vst.msk [vmem:[#allocation7 + $0x8] sm:$0xff] %vm863_vm1, %v881_v51 }
 0x1a5   :  { %v914_v52 = vpop.permute.xlu0 %913  ;;  %v887_v53 = vpop.permute.xlu1 %886 }
 0x1a6   :  { %938 = vst.msk [vmem:[#allocation7 + $0x10] sm:$0xff] %vm863_vm1, %v914_v52  ;;  %908 = vst.msk [vmem:[#allocation7 + $0x68] sm:$0xff] %vm863_vm1, %v887_v53 }
 0x1a9   :  { %v947_v54 = vpop.permute.xlu0 %946  ;;  %v920_v55 = vpop.permute.xlu1 %919 }
 0x1aa   :  { %971 = vst.msk [vmem:[#allocation7 + $0x18] sm:$0xff] %vm863_vm1, %v947_v54  ;;  %941 = vst.msk [vmem:[#allocation7 + $0x70] sm:$0xff] %vm863_vm1, %v920_v55 }
 0x1ad   :  { %v953_v56 = vpop.permute.xlu1 %952  ;;  %v918_v57 = vpop.permute.xlu0 %917 }
 0x1ae   :  { %974 = vst.msk [vmem:[#allocation7 + $0x78] sm:$0xff] %vm863_vm1, %v953_v56  ;;  %940 = vst.msk [vmem:[#allocation7 + $0x50] sm:$0xff] %vm863_vm1, %v918_v57 }
 0x1b1   :  { %v951_v58 = vpop.permute.xlu0 %950  ;;  %v885_v59 = vpop.permute.xlu1 %884 }
 0x1b2   :  { %973 = vst.msk [vmem:[#allocation7 + $0x58] sm:$0xff] %vm863_vm1, %v951_v58  ;;  %907 = vst.msk [vmem:[#allocation7 + $0x48] sm:$0xff] %vm863_vm1, %v885_v59 }
 0x1b5   :  { %v891_v60 = vpop.permute.xlu1 %890  ;;  %v889_v61 = vpop.permute.xlu0 %888 }
 0x1b6   :  { %910 = vst.msk [vmem:[#allocation7 + $0xa8] sm:$0xff] %vm863_vm1, %v891_v60  ;;  %909 = vst.msk [vmem:[#allocation7 + $0x88] sm:$0xff] %vm863_vm1, %v889_v61 }
 0x1b9   :  { %v924_v62 = vpop.permute.xlu1 %923  ;;  %v922_v63 = vpop.permute.xlu0 %921 }
 0x1ba   :  { %943 = vst.msk [vmem:[#allocation7 + $0xb0] sm:$0xff] %vm863_vm1, %v924_v62  ;;  %942 = vst.msk [vmem:[#allocation7 + $0x90] sm:$0xff] %vm863_vm1, %v922_v63 }
 0x1bd   :  { %v957_v0 = vpop.permute.xlu1 %956  ;;  %v955_v1 = vpop.permute.xlu0 %954 }
 0x1be   :  { %976 = vst.msk [vmem:[#allocation7 + $0xb8] sm:$0xff] %vm863_vm1, %v957_v0  ;;  %975 = vst.msk [vmem:[#allocation7 + $0x98] sm:$0xff] %vm863_vm1, %v955_v1 }
 0x1c1   :  { %v895_v2 = vpop.permute.xlu1 %894  ;;  %v893_v3 = vpop.permute.xlu0 %892 }
 0x1c2   :  { %912 = vst.msk [vmem:[#allocation7 + $0xe8] sm:$0xff] %vm863_vm1, %v895_v2  ;;  %911 = vst.msk [vmem:[#allocation7 + $0xc8] sm:$0xff] %vm863_vm1, %v893_v3 }
 0x1c5   :  { %v928_v4 = vpop.permute.xlu1 %927  ;;  %v926_v5 = vpop.permute.xlu0 %925 }
 0x1c6   :  { %945 = vst.msk [vmem:[#allocation7 + $0xf0] sm:$0xff] %vm863_vm1, %v928_v4  ;;  %944 = vst.msk [vmem:[#allocation7 + $0xd0] sm:$0xff] %vm863_vm1, %v926_v5 }
 0x1c9   :  { %v961_v6 = vpop.permute.xlu1 %960  ;;  %v959_v7 = vpop.permute.xlu0 %958 }
 0x1ca   :  { %978 = vst.msk [vmem:[#allocation7 + $0xf8] sm:$0xff] %vm863_vm1, %v961_v6  ;;  %977 = vst.msk [vmem:[#allocation7 + $0xd8] sm:$0xff] %vm863_vm1, %v959_v7 }
 0x1cb   :  { %1340 = shalt.err (!%p1337_p6)
}
 0x1cc   :  { %s1341_s13 = scalar_lea.hbm %s1608_s2, 4096 }
 0x1cd   :  { %p1342_p7 = scmp.ne.s32.totalorder %s1608_s2, %s1341_s13  ;;  %p1345_p8 = scmp.lt.u32.totalorder %s1341_s13, %s1608_s2 }
 0x1cf   :  { %p1347_p9 = pnand %p1345_p8, %p1342_p7 }
 0x1d1   :  { %1350 = shalt.err (!%p1347_p9)
}
 0x1d2   :  { %990 = dma.vmem_to_hbm [thread:$0]  %s985_s9, 4096, %s1608_s2, [#allocation4], %s1358_s19, %s1358_s19, %s1359_s20  }
 0x1d3   :  { %1355 = dma.done.wait [#allocation4], 4096  }
 0x1d4   :  { %1356 = vsyncadd [#allocation4], 4294963200 }
 0x1d5   :  { %994 = vsyncpa [#allocation3], 1 }
 0x1d6   :  { %995 = vsyncpa [#allocation6], 1 }
 0x1d7   :  { %996 = vsyncpa [#allocation4], 1 }

</bundles_post_ra>
